<compile_context>
chip_gen: v6e
topology: v6e:2x2x1
jax: 0.10.0
libtpu: 0.0.40
codegen_flags: <defaults>
</compile_context>

<pallas_src>
import functools

import jax
import jax.numpy as jnp
import numpy as np
from jax.experimental import pallas as pl
from jax.experimental.pallas import tpu as pltpu


def _round_up(x, m):
    return ((x + m - 1) // m) * m


def _default_tile_m():
    # Size M tiles conservatively for v7x's 64 MiB VMEM; go bigger on v5e/v6e.
    try:
        vmem = pltpu.get_tpu_info().vmem_capacity_bytes
    except Exception:
        vmem = 64 * 1024 * 1024
    return 512 if vmem <= 64 * 1024 * 1024 else 1024


# ---------------------------------------------------------------------------
# Phase 1: tiled conv matmul + per-channel sum / sum-of-squares (training BN).
# ---------------------------------------------------------------------------
def _conv_stats_kernel(p_ref, w_ref, y_ref, s1_ref, s2_ref, acc_ref):
    kk = pl.program_id(1)

    @pl.when(kk == 0)
    def _():
        acc_ref[...] = jnp.zeros_like(acc_ref)

    # bf16 x bf16 -> f32 accumulate on the MXU.
    acc_ref[...] += jnp.dot(p_ref[...], w_ref[...],
                            preferred_element_type=jnp.float32)

    @pl.when(kk == pl.num_programs(1) - 1)
    def _():
        y = acc_ref[...]                                   # (tile_m, C_pad) f32
        y_ref[...] = y
        # Single-pass stats from the f32 accumulator.  Zero-padded rows
        # contribute exactly 0, so no validity mask is needed.
        s1 = jnp.sum(y, axis=0, keepdims=True)             # (1, C_pad)
        s2 = jnp.sum(y * y, axis=0, keepdims=True)         # (1, C_pad)
        s1_ref[...] = jnp.broadcast_to(s1, s1_ref.shape)   # (8, C_pad)
        s2_ref[...] = jnp.broadcast_to(s2, s2_ref.shape)


# ---------------------------------------------------------------------------
# Phase 2: normalize + affine + LeakyReLU (fused into one FMA + select).
# ---------------------------------------------------------------------------
def _bn_lrelu_kernel(y_ref, scale_ref, shift_ref, o_ref, *, neg_slope):
    z = y_ref[...] * scale_ref[...] + shift_ref[...]
    o_ref[...] = jnp.where(z >= 0, z, neg_slope * z)


def _im2col(x, k, s):
    """x: (N, C, H, W) -> patches (N*Ho*Wo, C*k*k), channel-major then (kh, kw)."""
    n, c, h, w = x.shape
    ho = (h - k) // s + 1
    wo = (w - k) // s + 1
    cols = []
    for kh in range(k):
        for kw in range(k):
            cols.append(x[:, :, kh:kh + s * ho:s, kw:kw + s * wo:s])  # (N,C,Ho,Wo)
    p = jnp.stack(cols, axis=2)                    # (N, C, k*k, Ho, Wo)
    p = p.transpose(0, 3, 4, 1, 2)                 # (N, Ho, Wo, C, k*k)
    return p.reshape(n * ho * wo, c * k * k), (n, ho, wo)


def cnn_block_forward(x, weight, gamma, beta, *, stride=2, eps=1e-5,
                      neg_slope=0.2, matmul_dtype=jnp.bfloat16):
    """x: (N, C_in, H, W); weight: (C_out, C_in, 4, 4) OIHW; gamma/beta: (C_out,).

    Returns (N, C_out, Ho, Wo) float32, matching PyTorch CNNBlock.forward
    in training mode (batch statistics, biased variance).
    """
    k = weight.shape[-1]
    c_out = weight.shape[0]

    patches, (n, ho, wo) = _im2col(x.astype(jnp.float32), k, stride)
    m = patches.shape[0]
    kdim = patches.shape[1]                         # C_in * k * k

    # Lane-dense padding: C_out and K -> multiples of 128.
    c_pad = _round_up(c_out, 128)
    tile_k = min(512, _round_up(kdim, 128))
    k_pad = _round_up(kdim, tile_k)
    tile_m = min(_default_tile_m(), _round_up(m, 8))
    m_pad = _round_up(m, tile_m)
    num_m = m_pad // tile_m
    num_k = k_pad // tile_k

    # Zero-pad operands; cast matmul operands to bf16 (stats stay in f32).
    patches = jnp.pad(patches, ((0, m_pad - m), (0, k_pad - kdim))).astype(matmul_dtype)
    w2d = weight.reshape(c_out, kdim).T.astype(jnp.float32)          # (K, C_out)
    w2d = jnp.pad(w2d, ((0, k_pad - kdim), (0, c_pad - c_out))).astype(matmul_dtype)

    vmem_limit = 32 * 1024 * 1024

    # -------- Phase 1: conv + per-channel partial stats --------------------
    y_flat, s1p, s2p = pl.pallas_call(
        _conv_stats_kernel,
        out_shape=(jax.ShapeDtypeStruct((m_pad, c_pad), jnp.float32),
                   jax.ShapeDtypeStruct((num_m * 8, c_pad), jnp.float32),
                   jax.ShapeDtypeStruct((num_m * 8, c_pad), jnp.float32)),
        grid=(num_m, num_k),
        in_specs=[pl.BlockSpec((tile_m, tile_k), lambda i, kk: (i, kk)),
                  pl.BlockSpec((tile_k, c_pad), lambda i, kk: (kk, 0))],
        out_specs=(pl.BlockSpec((tile_m, c_pad), lambda i, kk: (i, 0)),
                   pl.BlockSpec((8, c_pad), lambda i, kk: (i, 0)),
                   pl.BlockSpec((8, c_pad), lambda i, kk: (i, 0))),
        scratch_shapes=[pltpu.VMEM((tile_m, c_pad), jnp.float32)],
        compiler_params=pltpu.CompilerParams(
            dimension_semantics=("parallel", "arbitrary"),
            vmem_limit_bytes=vmem_limit),
    )(patches, w2d)

    # -------- Tiny O(C) reduction + BN folding (XLA) ------------------------
    count = jnp.float32(m)
    s1 = s1p.reshape(num_m, 8, c_pad)[:, 0, :].sum(axis=0)           # (C_pad,)
    s2 = s2p.reshape(num_m, 8, c_pad)[:, 0, :].sum(axis=0)
    mean = s1 / count
    var = s2 / count - mean * mean                                   # biased var
    inv = jax.lax.rsqrt(var + eps)
    gamma_p = jnp.pad(gamma.astype(jnp.float32), (0, c_pad - c_out))
    beta_p = jnp.pad(beta.astype(jnp.float32), (0, c_pad - c_out))
    scale = (gamma_p * inv).reshape(1, c_pad)
    shift = (beta_p - mean * gamma_p * inv).reshape(1, c_pad)

    # -------- Phase 2: normalize + affine + LeakyReLU -----------------------
    out_flat = pl.pallas_call(
        functools.partial(_bn_lrelu_kernel, neg_slope=neg_slope),
        out_shape=jax.ShapeDtypeStruct((m_pad, c_pad), jnp.float32),
        grid=(num_m,),
        in_specs=[pl.BlockSpec((tile_m, c_pad), lambda i: (i, 0)),
                  pl.BlockSpec((1, c_pad), lambda i: (0, 0)),
                  pl.BlockSpec((1, c_pad), lambda i: (0, 0))],
        out_specs=pl.BlockSpec((tile_m, c_pad), lambda i: (i, 0)),
        compiler_params=pltpu.CompilerParams(
            dimension_semantics=("parallel",),
            vmem_limit_bytes=vmem_limit),
    )(y_flat, scale, shift)

    out = out_flat[:m, :c_out].reshape(n, ho, wo, c_out)
    # TODO(synk): emit NHWC / fuse this transpose into the phase-2 tile write.
    return out.transpose(0, 3, 1, 2)                                 # NCHW


def _reference(x, weight, gamma, beta, *, stride=2, eps=1e-5, neg_slope=0.2):
    """Pure-JAX f32 reference mirroring PyTorch semantics (train-mode BN)."""
    y = jax.lax.conv_general_dilated(
        x.astype(jnp.float32), weight.astype(jnp.float32),
        window_strides=(stride, stride), padding='VALID',
        dimension_numbers=('NCHW', 'OIHW', 'NCHW'))
    mean = jnp.mean(y, axis=(0, 2, 3), keepdims=True)
    var = jnp.mean((y - mean) ** 2, axis=(0, 2, 3), keepdims=True)
    y_hat = (y - mean) * jax.lax.rsqrt(var + eps)
    z = y_hat * gamma.reshape(1, -1, 1, 1) + beta.reshape(1, -1, 1, 1)
    return jnp.where(z >= 0, z, neg_slope * z)


if __name__ == "__main__":
    key = jax.random.PRNGKey(0)
    k_x, k_w, k_g, k_b = jax.random.split(key, 4)

    N, C_IN, C_OUT, H, W, STRIDE = 2, 4, 8, 16, 16, 2

    x = jax.random.normal(k_x, (N, C_IN, H, W), dtype=jnp.float32)
    weight = jax.random.normal(k_w, (C_OUT, C_IN, 4, 4), dtype=jnp.float32) * 0.1
    gamma = 1.0 + 0.1 * jax.random.normal(k_g, (C_OUT,), dtype=jnp.float32)
    beta = 0.1 * jax.random.normal(k_b, (C_OUT,), dtype=jnp.float32)

    out = cnn_block_forward(x, weight, gamma, beta, stride=STRIDE)
    out = jax.block_until_ready(out)

    ref = jax.block_until_ready(_reference(x, weight, gamma, beta, stride=STRIDE))

    assert out.shape == (N, C_OUT, (H - 4) // STRIDE + 1, (W - 4) // STRIDE + 1)
    # Tolerance accounts for intentional bf16 MXU operands (stats/epilogue in f32).
    np.testing.assert_allclose(np.asarray(out), np.asarray(ref), rtol=2e-2, atol=2e-2)

    print("KERNEL_OK")
</pallas_src>

<mosaic_0001>
module attributes {stable_mosaic.version = 11 : i64} {
  func.func @_conv_stats_kernel(%arg0: i32, %arg1: i32, %arg2: memref<104x128xbf16, #tpu.memory_space<vmem>>, %arg3: memref<128x128xbf16, #tpu.memory_space<vmem>>, %arg4: memref<104x128xf32, #tpu.memory_space<vmem>>, %arg5: memref<8x128xf32, #tpu.memory_space<vmem>>, %arg6: memref<8x128xf32, #tpu.memory_space<vmem>>, %arg7: memref<104x128xf32, #tpu.memory_space<vmem>>) attributes {dimension_semantics = [#tpu.dimension_semantics<parallel>, #tpu.dimension_semantics<arbitrary>], iteration_bounds = array<i64: 1, 1>, scalar_prefetch = 0 : i64, scratch_operands = 1 : i64, tpu.core_type = #tpu.core_type<tc>, window_params = [{transform_indices = @transform_0, window_bounds = array<i64: 104, 128>}, {transform_indices = @transform_1, window_bounds = array<i64: 128, 128>}, {transform_indices = @transform_2, window_bounds = array<i64: 104, 128>}, {transform_indices = @transform_3, window_bounds = array<i64: 8, 128>}, {transform_indices = @transform_4, window_bounds = array<i64: 8, 128>}]} {
    %c0_i32 = arith.constant 0 : i32
    %0 = arith.cmpi eq, %arg1, %c0_i32 : i32
    %1 = arith.extui %0 : i1 to i32
    %c0_i32_0 = arith.constant 0 : i32
    %2 = arith.cmpi ne, %1, %c0_i32_0 : i32
    scf.if %2 {
      %cst_10 = arith.constant 0.000000e+00 : f32
      %12 = vector.broadcast %cst_10 : f32 to vector<104x128xf32>
      %c0_11 = arith.constant 0 : index
      %c0_12 = arith.constant 0 : index
      %13 = vector.load %arg7[%c0_11, %c0_12] : memref<104x128xf32, #tpu.memory_space<vmem>>, vector<104x128xf32>
      tpu.vector_store %arg7[%c0_11, %c0_12], %12 {strides = array<i32>} : memref<104x128xf32, #tpu.memory_space<vmem>>, vector<104x128xf32>,
    } else {
    }
    %c0 = arith.constant 0 : index
    %c0_1 = arith.constant 0 : index
    %3 = vector.load %arg7[%c0, %c0_1] : memref<104x128xf32, #tpu.memory_space<vmem>>, vector<104x128xf32>
    %c0_2 = arith.constant 0 : index
    %c0_3 = arith.constant 0 : index
    %4 = vector.load %arg2[%c0_2, %c0_3] : memref<104x128xbf16, #tpu.memory_space<vmem>>, vector<104x128xbf16>
    %c0_4 = arith.constant 0 : index
    %c0_5 = arith.constant 0 : index
    %5 = vector.load %arg3[%c0_4, %c0_5] : memref<128x128xbf16, #tpu.memory_space<vmem>>, vector<128x128xbf16>
    %cst = arith.constant dense<0.000000e+00> : vector<104x128xf32>
    %6 = tpu.matmul %4, %5, %cst {dimension_numbers = #tpu.dot_dimension_numbers<[1], [0], [0], [1], [0, 0, 1, 1], [], []>} : vector<104x128xbf16>, vector<128x128xbf16>, vector<104x128xf32> -> vector<104x128xf32>
    %7 = arith.addf %3, %6 : vector<104x128xf32>
    %c0_6 = arith.constant 0 : index
    %c0_7 = arith.constant 0 : index
    %8 = vector.load %arg7[%c0_6, %c0_7] : memref<104x128xf32, #tpu.memory_space<vmem>>, vector<104x128xf32>
    tpu.vector_store %arg7[%c0_6, %c0_7], %7 {strides = array<i32>} : memref<104x128xf32, #tpu.memory_space<vmem>>, vector<104x128xf32>,
    %c0_i32_8 = arith.constant 0 : i32
    %9 = arith.cmpi eq, %arg1, %c0_i32_8 : i32
    %10 = arith.extui %9 : i1 to i32
    %c0_i32_9 = arith.constant 0 : i32
    %11 = arith.cmpi ne, %10, %c0_i32_9 : i32
    scf.if %11 {
      %c0_10 = arith.constant 0 : index
      %c0_11 = arith.constant 0 : index
      %12 = vector.load %arg7[%c0_10, %c0_11] : memref<104x128xf32, #tpu.memory_space<vmem>>, vector<104x128xf32>
      %c0_12 = arith.constant 0 : index
      %c0_13 = arith.constant 0 : index
      %13 = vector.load %arg4[%c0_12, %c0_13] : memref<104x128xf32, #tpu.memory_space<vmem>>, vector<104x128xf32>
      tpu.vector_store %arg4[%c0_12, %c0_13], %12 {strides = array<i32>} : memref<104x128xf32, #tpu.memory_space<vmem>>, vector<104x128xf32>,
      %cst_14 = arith.constant dense<0.000000e+00> : vector<128xf32>
      %14 = vector.multi_reduction <add>, %12, %cst_14 [0] : vector<104x128xf32> to vector<128xf32>
      %15 = vector.shape_cast %14 : vector<128xf32> to vector<1x128xf32>
      %16 = arith.mulf %12, %12 : vector<104x128xf32>
      %cst_15 = arith.constant dense<0.000000e+00> : vector<128xf32>
      %17 = vector.multi_reduction <add>, %16, %cst_15 [0] : vector<104x128xf32> to vector<128xf32>
      %18 = vector.shape_cast %17 : vector<128xf32> to vector<1x128xf32>
      %19 = vector.shape_cast %15 : vector<1x128xf32> to vector<1x128xf32>
      %20 = vector.broadcast %19 : vector<1x128xf32> to vector<8x128xf32>
      %c0_16 = arith.constant 0 : index
      %c0_17 = arith.constant 0 : index
      %21 = vector.load %arg5[%c0_16, %c0_17] : memref<8x128xf32, #tpu.memory_space<vmem>>, vector<8x128xf32>
      tpu.vector_store %arg5[%c0_16, %c0_17], %20 {strides = array<i32>} : memref<8x128xf32, #tpu.memory_space<vmem>>, vector<8x128xf32>,
      %22 = vector.shape_cast %18 : vector<1x128xf32> to vector<1x128xf32>
      %23 = vector.broadcast %22 : vector<1x128xf32> to vector<8x128xf32>
      %c0_18 = arith.constant 0 : index
      %c0_19 = arith.constant 0 : index
      %24 = vector.load %arg6[%c0_18, %c0_19] : memref<8x128xf32, #tpu.memory_space<vmem>>, vector<8x128xf32>
      tpu.vector_store %arg6[%c0_18, %c0_19], %23 {strides = array<i32>} : memref<8x128xf32, #tpu.memory_space<vmem>>, vector<8x128xf32>,
    } else {
    }
    return
  }
  func.func @transform_0(%arg0: i32, %arg1: i32) -> (i32, i32) {
    %c0_i32 = arith.constant 0 : i32
    return %arg0, %arg1 : i32, i32
  }
  func.func @transform_1(%arg0: i32, %arg1: i32) -> (i32, i32) {
    %c0_i32 = arith.constant 0 : i32
    %c0_i32_0 = arith.constant 0 : i32
    return %arg1, %c0_i32 : i32, i32
  }
  func.func @transform_2(%arg0: i32, %arg1: i32) -> (i32, i32) {
    %c0_i32 = arith.constant 0 : i32
    %c0_i32_0 = arith.constant 0 : i32
    return %arg0, %c0_i32 : i32, i32
  }
  func.func @transform_3(%arg0: i32, %arg1: i32) -> (i32, i32) {
    %c0_i32 = arith.constant 0 : i32
    %c0_i32_0 = arith.constant 0 : i32
    return %arg0, %c0_i32 : i32, i32
  }
  func.func @transform_4(%arg0: i32, %arg1: i32) -> (i32, i32) {
    %c0_i32 = arith.constant 0 : i32
    %c0_i32_0 = arith.constant 0 : i32
    return %arg0, %c0_i32 : i32, i32
  }
}

</mosaic_0001>

<bundles_post_ra>
// kernel: tpu_custom_call.1
= control target key start
LH: loop header
LB: loop body
LE: loop exit
PB: predicated region body
PF: predicated region fallthrough
CT: control target
= control target key end

     0   :  { %10 = vsyncpa [#allocation4], 0  ;;  %s743_s0 = inlined_call_operand.hbm [shape: bf16[104,128], index: 0, kind: input, shape index: {}]   ;;  %s744_s1 = inlined_call_operand.hbm [shape: bf16[128,128], index: 1, kind: input, shape index: {}]   ;;  %s745_s2 = inlined_call_operand.hbm [shape: f32[104,128], index: 2, kind: output, shape index: {0}]   ;;  %s746_s3 = inlined_call_operand.hbm [shape: f32[8,128], index: 3, kind: output, shape index: {1}]   ;;  %s747_s4 = inlined_call_operand.hbm [shape: f32[8,128], index: 4, kind: output, shape index: {2}]  }
   0x1   :  { %11 = vsyncpa [#allocation7], 0 }
   0x2   :  { %12 = vsyncpa [#allocation5], 0 }
   0x3   :  { %13 = vsyncpa [#allocation10], 0  ;;  %s655_s15 = smov [#allocation3]  }
   0x4   :  { %s19_s16 = sshll.u32 %s655_s15, 4  ;;  %s20_s16 = int_to_ptr.vmem [resolvable:$true] %s19_s16 }
   0x5   :  { %s555_s17 = scalar_lea.vmem %s20_s16, 832  ;;  %p560_p1 = scmp.lt.s32.totalorder %s20_s16, %s20_s16 }
   0x6   :  { %p556_p0 = scmp.ne.s32.totalorder %s20_s16, %s555_s17  ;;  %p561_p2 = scmp.lt.s32.totalorder %s555_s17, %s555_s17 }
   0x8   :  { %p562_p3 = por %p561_p2, %p560_p1 }
   0xa   :  { %p563_p4 = pnand %p562_p3, %p556_p0 }
   0xc   :  { %566 = shalt.err (!%p563_p4)
}
   0xd   :  { %s656_s18 = smov 64   ;;  %s657_s19 = smov 4  }
   0xe   :  { %25 = dma.hbm_to_vmem [thread:$0]  %s743_s0, 832, %s20_s16, [#allocation4], %s656_s18, %s656_s18, %s657_s19  }
   0xf   :  { %s658_s22 = smov [#allocation6]  }
  0x10   :  { %s31_s23 = sshll.u32 %s658_s22, 4  ;;  %s32_s23 = int_to_ptr.vmem [resolvable:$true] %s31_s23 }
  0x11   :  { %s575_s24 = scalar_lea.vmem %s32_s23, 1024  ;;  %p580_p6 = scmp.lt.s32.totalorder %s32_s23, %s32_s23 }
  0x12   :  { %p576_p5 = scmp.ne.s32.totalorder %s32_s23, %s575_s24  ;;  %p581_p7 = scmp.lt.s32.totalorder %s575_s24, %s575_s24 }
  0x14   :  { %p582_p8 = por %p581_p7, %p580_p6 }
  0x16   :  { %p583_p9 = pnand %p582_p8, %p576_p5 }
  0x18   :  { %586 = shalt.err (!%p583_p9)
}
  0x19   :  { %37 = dma.hbm_to_vmem [thread:$0]  %s744_s1, 1024, %s32_s23, [#allocation7], %s656_s18, %s656_s18, %s657_s19  }
  0x1a   :  { %647 = dma.done.wait [#allocation4], 832  }
  0x1b   :  { %648 = vsyncadd [#allocation4], 4294966464 }
  0x1c   :  { %649 = dma.done.wait [#allocation7], 1024  }
  0x1d   :  { %650 = vsyncadd [#allocation7], 4294966272  ;;  %v659_v0 = vmov 0.0   ;;  %vm660_vm0 = vmmov 0   ;;  %v532_v1 = vld [vmem:[#allocation6 + $0x38] sm:$0xff]   ;;  %v533_v2 = vld [vmem:[#allocation6 + $0x30] sm:$0xff]  }
  0x1e   :  { %461 = vmatprep.subr.bf16.mxu0 %v659_v0  ;;  %505 = vmatprep.subr.bf16.mxu1 %v659_v0  ;;  %v534_v3 = vld [vmem:[#allocation6 + $0x28] sm:$0xff]   ;;  %v535_v4 = vld [vmem:[#allocation6 + $0x20] sm:$0xff]   ;;  %v536_v5 = vld [vmem:[#allocation6 + $0x18] sm:$0xff]   ;;  %s661_s0 = smov [#allocation8]  }
  0x1f   :  { %477 = vmatprep.mubr.msk.bf16.mxu0 %vm660_vm0, %v659_v0  ;;  %493 = vmatprep.mubr.msk.bf16.mxu1 %vm660_vm0, %v659_v0  ;;  %v537_v6 = vld [vmem:[#allocation6 + $0x10] sm:$0xff]   ;;  %v538_v7 = vld [vmem:[#allocation6 + $0x8] sm:$0xff]   ;;  %v539_v8 = vld [vmem:[#allocation6] sm:$0xff]   ;;  %s391_s1 = sshll.u32 %s661_s0, 4  ;;  %s392_s1 = int_to_ptr.vmem [resolvable:$true] %s391_s1 }
  0x20   :  { %462 = vmatpush3.bf16.msra.mxu0 %v532_v1  ;;  %513 = vmatpush3.bf16.msra.mxu1 %v532_v1  ;;  %v540_v9 = vld [vmem:[#allocation3] sm:$0xff]   ;;  %v541_v11 = vld [vmem:[#allocation3 + $0x8] sm:$0xff]   ;;  %v542_v13 = vld [vmem:[#allocation3 + $0x10] sm:$0xff]   ;;  %s587_s27 = scalar_lea.vmem %s392_s1, 1664  ;;  %p592_p11 = scmp.lt.s32.totalorder %s392_s1, %s392_s1 }
  0x21   :  { %463 = vmatprep.subr.bf16.mxu0 %v659_v0  ;;  %506 = vmatprep.subr.bf16.mxu1 %v659_v0  ;;  %v543_v10 = vld [vmem:[#allocation3 + $0x20] sm:$0xff]   ;;  %v545_v12 = vld [vmem:[#allocation3 + $0x28] sm:$0xff]   ;;  %v546_v14 = vld [vmem:[#allocation3 + $0x30] ss:$0 sps:$4 sm:$0xff]   ;;  %p588_p10 = scmp.ne.s32.totalorder %s392_s1, %s587_s27  ;;  %p593_p12 = scmp.lt.s32.totalorder %s587_s27, %s587_s27 }
  0x22   :  { %v544_v15 = vld [vmem:[#allocation3 + $0x18] sm:$0xff]  }
  0x23   :  { %p594_p13 = por %p593_p12, %p592_p11 }
  0x24   :  { %464 = vmatpush3.bf16.msra.mxu0 %v533_v2  ;;  %514 = vmatpush3.bf16.msra.mxu1 %v533_v2 }
  0x25   :  { %465 = vmatprep.subr.bf16.mxu0 %v659_v0  ;;  %507 = vmatprep.subr.bf16.mxu1 %v659_v0  ;;  %p595_p0 = pnand %p594_p13, %p588_p10 }
  0x28   :  { %466 = vmatpush3.bf16.msra.mxu0 %v534_v3  ;;  %515 = vmatpush3.bf16.msra.mxu1 %v534_v3 }
  0x29   :  { %467 = vmatprep.subr.bf16.mxu0 %v659_v0  ;;  %508 = vmatprep.subr.bf16.mxu1 %v659_v0 }
  0x2c   :  { %468 = vmatpush3.bf16.msra.mxu0 %v535_v4  ;;  %516 = vmatpush3.bf16.msra.mxu1 %v535_v4 }
  0x2d   :  { %469 = vmatprep.subr.bf16.mxu0 %v659_v0  ;;  %509 = vmatprep.subr.bf16.mxu1 %v659_v0 }
  0x30   :  { %470 = vmatpush3.bf16.msra.mxu0 %v536_v5  ;;  %517 = vmatpush3.bf16.msra.mxu1 %v536_v5 }
  0x31   :  { %471 = vmatprep.subr.bf16.mxu0 %v659_v0  ;;  %510 = vmatprep.subr.bf16.mxu1 %v659_v0 }
  0x34   :  { %472 = vmatpush3.bf16.msra.mxu0 %v537_v6  ;;  %518 = vmatpush3.bf16.msra.mxu1 %v537_v6 }
  0x35   :  { %473 = vmatprep.subr.bf16.mxu0 %v659_v0  ;;  %511 = vmatprep.subr.bf16.mxu1 %v659_v0 }
  0x38   :  { %474 = vmatpush3.bf16.msra.mxu0 %v538_v7  ;;  %519 = vmatpush3.bf16.msra.mxu1 %v538_v7 }
  0x39   :  { %475 = vmatprep.subr.bf16.mxu0 %v659_v0  ;;  %512 = vmatprep.subr.bf16.mxu1 %v659_v0 }
  0x3c   :  { %476 = vmatpush3.bf16.msra.mxu0 %v539_v8  ;;  %520 = vmatpush3.bf16.msra.mxu1 %v539_v8 }
  0x3f   :  { %478 = vmatmul.mubr.bf16.vlgmr.msra.gmra.mxu0 %v540_v9  ;;  %494 = vmatmul.mubr.bf16.vlgmr.msra.gmra.mxu1 %v543_v10 }
  0x40   :  { %481 = vmatprep.mubr.msk.bf16.mxu0 %vm660_vm0, %v659_v0  ;;  %497 = vmatprep.mubr.msk.bf16.mxu1 %vm660_vm0, %v659_v0 }
  0x47   :  { %482 = vmatmul.mubr.bf16.gmra.mxu0 %v541_v11  ;;  %498 = vmatmul.mubr.bf16.gmra.mxu1 %v545_v12 }
  0x48   :  { %485 = vmatprep.mubr.msk.bf16.mxu0 %vm660_vm0, %v659_v0  ;;  %501 = vmatprep.mubr.msk.bf16.mxu1 %vm660_vm0, %v659_v0 }
  0x4f   :  { %486 = vmatmul.mubr.bf16.gmra.mxu0 %v542_v13  ;;  %502 = vmatmul.mubr.bf16.gmra.mxu1 %v546_v14 }
  0x50   :  { %489 = vmatprep.mubr.msk.bf16.mxu0 %vm660_vm0, %v659_v0 }
  0x57   :  { %490 = vmatmul.mubr.bf16.gmra.mxu0 %v544_v15 }
  0xff   :  { %v226_v16 = vpop.f32.mrf.mxu0  ;;  %v704_v17 = vpop.f32.mrf.mxu1 }
 0x100   :  { %322 = vst [vmem:[#allocation8] sm:$0xff] %v226_v16  ;;  %330 = vst [vmem:[#allocation8 + $0x40] sm:$0xff] %v704_v17  ;;  %v353_v35 = vmul.f32 %v226_v16, %v226_v16 }
 0x101   :  { %v479_v18 = vpop.f32.mrf.mxu0  ;;  %v495_v19 = vpop.f32.mrf.mxu1 }
 0x103   :  { %v229_v20 = vpop.f32.mrf.mxu0  ;;  %v707_v21 = vpop.f32.mrf.mxu1 }
 0x104   :  { %323 = vst [vmem:[#allocation8 + $0x8] sm:$0xff] %v229_v20  ;;  %331 = vst [vmem:[#allocation8 + $0x48] sm:$0xff] %v707_v21  ;;  %v354_v32 = vmul.f32 %v229_v20, %v229_v20  ;;  %v335_v36 = vadd.f32 %v229_v20, %v226_v16 }
 0x105   :  { %v480_v22 = vpop.f32.mrf.mxu0  ;;  %v496_v23 = vpop.f32.mrf.mxu1 }
 0x106   :  { %v366_v40 = vadd.f32 %v354_v32, %v353_v35 }
 0x107   :  { %v234_v24 = vpop.f32.mrf.mxu0  ;;  %v710_v25 = vpop.f32.mrf.mxu1 }
 0x108   :  { %324 = vst [vmem:[#allocation8 + $0x10] sm:$0xff] %v234_v24  ;;  %332 = vst [vmem:[#allocation8 + $0x50] sm:$0xff] %v710_v25  ;;  %v355_v37 = vmul.f32 %v234_v24, %v234_v24  ;;  %v336_v41 = vadd.f32 %v335_v36, %v234_v24 }
 0x109   :  { %v483_v26 = vpop.f32.mrf.mxu0  ;;  %v499_v27 = vpop.f32.mrf.mxu1 }
 0x10a   :  { %v367_v45 = vadd.f32 %v366_v40, %v355_v37 }
 0x10b   :  { %v237_v28 = vpop.f32.mrf.mxu0  ;;  %v713_v29 = vpop.f32.mrf.mxu1 }
 0x10c   :  { %325 = vst [vmem:[#allocation8 + $0x18] sm:$0xff] %v237_v28  ;;  %333 = vst [vmem:[#allocation8 + $0x58] sm:$0xff] %v713_v29  ;;  %v356_v42 = vmul.f32 %v237_v28, %v237_v28  ;;  %v337_v46 = vadd.f32 %v336_v41, %v237_v28 }
 0x10d   :  { %v484_v30 = vpop.f32.mrf.mxu0  ;;  %v500_v31 = vpop.f32.mrf.mxu1 }
 0x10e   :  { %v368_v50 = vadd.f32 %v367_v45, %v356_v42 }
 0x10f   :  { %v242_v33 = vpop.f32.mrf.mxu0  ;;  %v716_v34 = vpop.f32.mrf.mxu1 }
 0x110   :  { %326 = vst [vmem:[#allocation8 + $0x20] sm:$0xff] %v242_v33  ;;  %334 = vst [vmem:[#allocation8 + $0x60] sm:$0xff] %v716_v34  ;;  %v357_v47 = vmul.f32 %v242_v33, %v242_v33  ;;  %v338_v51 = vadd.f32 %v337_v46, %v242_v33 }
 0x111   :  { %v487_v38 = vpop.f32.mrf.mxu0  ;;  %v503_v39 = vpop.f32.mrf.mxu1 }
 0x112   :  { %v369_v54 = vadd.f32 %v368_v50, %v357_v47 }
 0x113   :  { %v245_v43 = vpop.f32.mrf.mxu0  ;;  %v277_v44 = vpop.f32.mrf.mxu1 }
 0x114   :  { %327 = vst [vmem:[#allocation8 + $0x28] sm:$0xff] %v245_v43  ;;  %v358_v52 = vmul.f32 %v245_v43, %v245_v43  ;;  %v339_v55 = vadd.f32 %v338_v51, %v245_v43 }
 0x115   :  { %v488_v48 = vpop.f32.mrf.mxu0  ;;  %v504_v49 = vpop.f32.mrf.mxu1 }
 0x116   :  { %v370_v58 = vadd.f32 %v369_v54, %v358_v52 }
 0x117   :  { %v250_v53 = vpop.f32.mrf.mxu0 }
 0x118   :  { %328 = vst [vmem:[#allocation8 + $0x30] sm:$0xff] %v250_v53  ;;  %v359_v56 = vmul.f32 %v250_v53, %v250_v53  ;;  %v340_v59 = vadd.f32 %v339_v55, %v250_v53 }
 0x119   :  { %v491_v57 = vpop.f32.mrf.mxu0 }
 0x11a   :  { %v371_v61 = vadd.f32 %v370_v58, %v359_v56 }
 0x11b   :  { %v253_v60 = vpop.f32.mrf.mxu0 }
 0x11c   :  { %329 = vst [vmem:[#allocation8 + $0x38] sm:$0xff] %v253_v60  ;;  %v341_v62 = vadd.f32 %v340_v59, %v253_v60  ;;  %v360_v63 = vmul.f32 %v253_v60, %v253_v60 }
 0x11d   :  { %v492_v0 = vpop.f32.mrf.mxu0 }
 0x11e   :  { %598 = shalt.err (!%p595_p0)
}
 0x11f   :  { %s662_s28 = smov 128   ;;  %s663_s29 = smov 8   ;;  %v361_v1 = vmul.f32 %v704_v17, %v704_v17  ;;  %v342_v2 = vadd.f32 %v341_v62, %v704_v17  ;;  %v372_v3 = vadd.f32 %v371_v61, %v360_v63  ;;  %v362_v4 = vmul.f32 %v707_v21, %v707_v21 }
 0x120   :  { %397 = dma.vmem_to_hbm [thread:$0]  %s392_s1, 1664, %s745_s2, [#allocation5], %s662_s28, %s662_s28, %s663_s29   ;;  %v363_v7 = vmul.f32 %v710_v25, %v710_v25  ;;  %v364_v11 = vmul.f32 %v713_v29, %v713_v29  ;;  %v365_v13 = vmul.f32 %v716_v34, %v716_v34 }
 0x121   :  { %v373_v5 = vadd.f32 %v372_v3, %v361_v1  ;;  %v343_v6 = vadd.f32 %v342_v2, %v707_v21  ;;  %s664_s2 = smov [#allocation9]   ;;  %s665_s7 = smov [#allocation11]  }
 0x122   :  { %s404_s6 = sshll.u32 %s664_s2, 4  ;;  %s414_s8 = sshll.u32 %s665_s7, 4  ;;  %s405_s6 = int_to_ptr.vmem [resolvable:$true] %s404_s6  ;;  %s415_s8 = int_to_ptr.vmem [resolvable:$true] %s414_s8 }
 0x123   :  { %v344_v8 = vadd.f32 %v343_v6, %v710_v25  ;;  %v374_v9 = vadd.f32 %v373_v5, %v362_v4  ;;  %s607_s9 = scalar_lea.vmem %s405_s6, 128  ;;  %p612_p2 = scmp.lt.s32.totalorder %s405_s6, %s405_s6 }
 0x124   :  { %p608_p1 = scmp.ne.s32.totalorder %s405_s6, %s607_s9  ;;  %p613_p3 = scmp.lt.s32.totalorder %s607_s9, %s607_s9 }
 0x125   :  { %v345_v10 = vadd.f32 %v344_v8, %v713_v29  ;;  %v375_v12 = vadd.f32 %v374_v9, %v363_v7 }
 0x126   :  { %p614_p4 = por %p613_p3, %p612_p2 }
 0x127   :  { %v376_v14 = vadd.f32 %v375_v12, %v364_v11  ;;  %v346_v15 = vadd.f32 %v345_v10, %v716_v34 }
 0x128   :  { %p615_p5 = pnand %p614_p4, %p608_p1 }
 0x129   :  { %v347_v16 = vrot.slane %v346_v15, 4  ;;  %v377_v17 = vadd.f32 %v376_v14, %v365_v13 }
 0x12b   :  { %v348_v18 = vadd.f32 %v347_v16, %v346_v15  ;;  %v378_v19 = vrot.slane %v377_v17, 4 }
 0x12d   :  { %v349_v20 = vrot.slane %v348_v18, 2  ;;  %v379_v21 = vadd.f32 %v378_v19, %v377_v17 }
 0x12f   :  { %v350_v22 = vadd.f32 %v349_v20, %v348_v18  ;;  %v380_v23 = vrot.slane %v379_v21, 2 }
 0x131   :  { %v351_v24 = vrot.slane %v350_v22, 1  ;;  %v381_v25 = vadd.f32 %v380_v23, %v379_v21 }
 0x133   :  { %v352_v26 = vadd.f32 %v351_v24, %v350_v22  ;;  %v382_v27 = vrot.slane %v381_v25, 1 }
 0x135   :  { %384 = vst [vmem:[#allocation9] sm:$0xff] %v352_v26  ;;  %v383_v28 = vadd.f32 %v382_v27, %v381_v25 }
 0x136   :  { %618 = shalt.err (!%p615_p5)
}
 0x137   :  { %407 = dma.vmem_to_hbm [thread:$0]  %s405_s6, 128, %s746_s3, [#allocation10]   ;;  %385 = vst [vmem:[#allocation11] sm:$0xff] %v383_v28 }
 0x138   :  { %s627_s12 = scalar_lea.vmem %s415_s8, 128  ;;  %p632_p7 = scmp.lt.s32.totalorder %s415_s8, %s415_s8 }
 0x139   :  { %p628_p6 = scmp.ne.s32.totalorder %s415_s8, %s627_s12  ;;  %p633_p8 = scmp.lt.s32.totalorder %s627_s12, %s627_s12 }
 0x13b   :  { %p634_p9 = por %p633_p8, %p632_p7 }
 0x13d   :  { %p635_p10 = pnand %p634_p9, %p628_p6 }
 0x13f   :  { %638 = shalt.err (!%p635_p10)
}
 0x140   :  { %417 = dma.vmem_to_hbm [thread:$0]  %s415_s8, 128, %s747_s4, [#allocation10]  }
 0x141   :  { %651 = dma.done.wait [#allocation5], 1664  }
 0x142   :  { %652 = vsyncadd [#allocation5], 4294965632 }
 0x143   :  { %653 = dma.done.wait [#allocation10], 256  }
 0x144   :  { %654 = vsyncadd [#allocation10], 4294967040 }
 0x145   :  { %427 = vsyncpa [#allocation4], 1 }
 0x146   :  { %428 = vsyncpa [#allocation7], 1 }
 0x147   :  { %429 = vsyncpa [#allocation5], 1 }
 0x148   :  { %430 = vsyncpa [#allocation10], 1 }

</bundles_post_ra>
